<compile_context>
chip_gen: v7x
topology: tpu7x:2x2x1
jax: 0.10.0
libtpu: 0.0.40
codegen_flags: <defaults>
</compile_context>

<pallas_src>
import jax
import jax.numpy as jnp
from jax.experimental import pallas as pl
from jax.experimental.pallas import tpu as pltpu


def _dma_copy_kernel(x_hbm, o_hbm, sem):
    # One HBM→HBM DMA for the whole array: no VMEM staging, no vreg traffic.
    cp = pltpu.make_async_copy(x_hbm, o_hbm, sem)
    cp.start()
    cp.wait()


def _pallas_hbm_copy(x):
    """Identity-copy `x` with a single HBM→HBM DMA issued from a Pallas kernel."""
    nbytes = x.size * jnp.dtype(x.dtype).itemsize
    return pl.pallas_call(
        _dma_copy_kernel,
        out_shape=jax.ShapeDtypeStruct(x.shape, x.dtype),
        in_specs=[pl.BlockSpec(memory_space=pl.ANY)],   # raw HBM ref, no auto-DMA
        out_specs=pl.BlockSpec(memory_space=pl.ANY),    # raw HBM ref, no auto-DMA
        scratch_shapes=[pltpu.SemaphoreType.DMA(())],
        cost_estimate=pl.CostEstimate(
            flops=0,
            transcendentals=0,
            bytes_accessed=2 * nbytes,  # pure bandwidth op
        ),
    )(x)


def _resolve_size(size, total):
    """Resolve a single -1 in `size`, validating exactly like torch.view."""
    size = list(size)
    neg = [i for i, s in enumerate(size) if s == -1]
    if len(neg) > 1:
        raise ValueError("only one dimension can be inferred (-1)")
    if neg:
        known = 1
        for j, s in enumerate(size):
            if j != neg[0]:
                known *= s
        if known == 0 or total % known != 0:
            raise ValueError(
                f"shape {tuple(size)} is invalid for input of size {total}"
            )
        size[neg[0]] = total // known
    else:
        prod = 1
        for s in size:
            prod *= s
        if prod != total:
            raise ValueError(
                f"shape {tuple(size)} is invalid for input of size {total}"
            )
    return tuple(size)


def view_forward(tensor, size, materialize=False):
    """Equivalent of torch.Tensor.view(size) (row-major reshape).

    Default: metadata-only reshape (zero data movement — the faithful
    torch.view semantics).  Set materialize=True to route the data through
    the Pallas HBM→HBM DMA copy kernel.
    """
    total = tensor.size
    size = _resolve_size(size, total)

    if (not materialize) or total == 0 or tensor.ndim == 0:
        return tensor.reshape(size)

    y = _pallas_hbm_copy(tensor)
    return y.reshape(size)  # metadata-only reshape of the copied buffer


if __name__ == "__main__":
    key = jax.random.PRNGKey(0)

    # Example input consistent with an NCHW activation: (2, 4, 16, 16).
    x = jax.random.normal(key, (2, 4, 16, 16), dtype=jnp.float32)
    ref = x.reshape(2, -1)

    # 1) Default (metadata-only) path — the true torch.view equivalent.
    y_meta = jax.block_until_ready(view_forward(x, (2, -1)))
    assert y_meta.shape == ref.shape and y_meta.dtype == ref.dtype
    assert bool(jnp.all(y_meta == ref))

    # 2) Materialized path — exercises the Pallas HBM→HBM DMA kernel once.
    y_dma = jax.block_until_ready(view_forward(x, (2, -1), materialize=True))
    assert y_dma.shape == ref.shape and y_dma.dtype == ref.dtype
    assert bool(jnp.all(y_dma == ref))

    # 3) Unaligned total (3*5*7 elements) through the DMA kernel — no lane
    #    alignment requirement since the copy never touches VMEM tiles.
    k2 = jax.random.PRNGKey(1)
    x_odd = jax.random.normal(k2, (3, 5, 7), dtype=jnp.float32)
    y_odd = jax.block_until_ready(view_forward(x_odd, (5, -1), materialize=True))
    assert y_odd.shape == (5, 21)
    assert bool(jnp.all(y_odd == x_odd.reshape(5, 21)))

    # 4) bf16 dtype through the DMA kernel (dtype-agnostic copy).
    k3 = jax.random.PRNGKey(2)
    x_bf16 = jax.random.normal(k3, (8, 32), dtype=jnp.bfloat16)
    y_bf16 = jax.block_until_ready(view_forward(x_bf16, (-1,), materialize=True))
    assert y_bf16.shape == (8 * 32,)
    assert bool(jnp.all(y_bf16 == x_bf16.reshape(-1)))

    print("KERNEL_OK")
</pallas_src>

<mosaic_0001>
module attributes {stable_mosaic.version = 11 : i64} {
  func.func @_dma_copy_kernel(%arg0: memref<2x4x16x16xf32, #tpu.memory_space<any>>, %arg1: memref<2x4x16x16xf32, #tpu.memory_space<any>>, %arg2: memref<!tpu.dma_semaphore, #tpu.memory_space<semaphore_mem>>) attributes {dimension_semantics = [], scalar_prefetch = 0 : i64, scratch_operands = 1 : i64, tpu.core_type = #tpu.core_type<tc>} {
    tpu.enqueue_dma source(%arg0 : memref<2x4x16x16xf32, #tpu.memory_space<any>>) target(%arg1 : memref<2x4x16x16xf32, #tpu.memory_space<any>>) target_semaphore(%arg2 : memref<!tpu.dma_semaphore, #tpu.memory_space<semaphore_mem>>)
    tpu.wait_dma2 semaphore(%arg2 : memref<!tpu.dma_semaphore, #tpu.memory_space<semaphore_mem>>) src(%arg0 : memref<2x4x16x16xf32, #tpu.memory_space<any>>) dst(%arg1 : memref<2x4x16x16xf32, #tpu.memory_space<any>>)
    return
  }
}

</mosaic_0001>

<bundles_post_ra>
// kernel: tpu_custom_call.1
= control target key start
LH: loop header
LB: loop body
LE: loop exit
PB: predicated region body
PF: predicated region fallthrough
CT: control target
= control target key end

     0   :  { %s36_s6 = smov [#allocation2]   ;;  %s37_s7 = smov [#allocation3]   ;;  %s55_s0 = inlined_call_operand.hbm [shape: f32[2,4,16,16], index: 0, kind: input, shape index: {}]   ;;  %s56_s1 = inlined_call_operand.hbm [shape: f32[2,4,16,16], index: 1, kind: output, shape index: {}]  }
   0x1   :  { %s38_s8 = smov 0  }
   0x2   :  { %18 = dma.general %s55_s0, 2048, %s56_s1, %s36_s6, %s37_s7, [#allocation4], %s38_s8, 0  }
   0x3   :  { %34 = dma.done.wait [#allocation2], 2048 }
   0x4   :  { %35 = vsyncadd [#allocation2], 4294965248 }
   0x5   :  { %24 = vsyncmov [#allocation2] }
   0x8   :  { %s25_s13 = vpop.sfrf %24 }
   0x9   :  { %p30_p0 = scmp.ne.s32.totalorder %s25_s13, 0 }
   0xb   :  { %29 = shalt.err (%p30_p0)  }

</bundles_post_ra>
